<compile_context>
chip_gen: v6e
topology: v6e:2x2x1
jax: 0.10.0
libtpu: 0.0.40
codegen_flags: <defaults>
</compile_context>

<pallas_src>
import jax
import jax.numpy as jnp
from jax.experimental import pallas as pl
from jax.experimental.pallas import tpu as pltpu


def _round_up(x, m):
    return ((x + m - 1) // m) * m


def _round_down(x, m):
    return (x // m) * m


_TARGET_STEP_BYTES = 2 * 1024 * 1024   # amortize ~0.35us per-grid-step overhead
_VMEM_BLOCK_BUDGET = 8 * 1024 * 1024   # double-buffered in+out pixel blocks


def _choose_tl(L, n_batch, cin, cout, in_bytes, out_bytes):
    """Pick the pixel-axis (lane) tile size."""
    if L <= 128:
        return L  # full-dim block satisfies the (8,128) rule by equality
    col_bytes = cin * in_bytes + cout * out_bytes
    tl = _round_down(max(_TARGET_STEP_BYTES // col_bytes, 128), 128)
    tl_vmem = _round_down(max(_VMEM_BLOCK_BUDGET // (2 * col_bytes), 128), 128)
    tl = min(tl, tl_vmem, _round_down(L, 128))
    # v7x megacore: make sure the parallel axes provide >= 2 grid steps.
    if n_batch == 1 and (L + tl - 1) // tl < 2:
        tl = max(128, _round_up((L + 1) // 2, 128))
    return tl


def conv1x1_kernel(x_ref, w_ref, b_ref, o_ref):
    # x_ref: (Cin, TL), w_ref: (Cout, Cin), b_ref: (Cout, 1), o_ref: (Cout, TL)
    acc = jnp.dot(w_ref[...], x_ref[...], preferred_element_type=jnp.float32)
    o_ref[...] = (acc + b_ref[...]).astype(o_ref.dtype)


def subsumpling_forward(x, weight, bias, *, compute_dtype=None):
    """1x1 conv, stride 2, NCHW.

    x: (N, Cin, H, W); weight: (Cout, Cin, 1, 1); bias: (Cout,).
    compute_dtype: dtype for activations/weight inside the kernel
      (f32 accumulation and f32 bias add regardless).  Default: x.dtype.
    """
    N, Cin, H, W = x.shape
    Cout = weight.shape[0]
    Ho = (H - 1) // 2 + 1            # kernel_size=1, stride=2, padding=0
    Wo = (W - 1) // 2 + 1
    L = Ho * Wo
    out_dtype = x.dtype
    if compute_dtype is None:
        compute_dtype = x.dtype

    # ---- glue: subsample first (4x less data), free reshapes, no transposes.
    xs = x[:, :, ::2, ::2].reshape(N, Cin, L).astype(compute_dtype)
    wm = weight.reshape(Cout, Cin).astype(compute_dtype)
    bm = bias.reshape(Cout, 1).astype(jnp.float32)      # bias add stays f32

    in_b = jnp.dtype(compute_dtype).itemsize
    out_b = jnp.dtype(out_dtype).itemsize
    TL = _choose_tl(L, N, Cin, Cout, in_b, out_b)
    grid = (N, pl.cdiv(L, TL))

    cost = pl.CostEstimate(
        flops=2 * N * L * Cin * Cout,
        transcendentals=0,
        bytes_accessed=(N * L * (Cin * in_b + Cout * out_b)
                        + Cin * Cout * in_b + Cout * 4),
    )

    out = pl.pallas_call(
        conv1x1_kernel,
        out_shape=jax.ShapeDtypeStruct((N, Cout, L), out_dtype),
        grid=grid,
        in_specs=[
            # streamed activation pixels: (Cin, TL), batch squeezed out
            pl.BlockSpec((pl.Squeezed(), Cin, TL), lambda n, l: (n, 0, l)),
            # resident weight / bias (tiny for these channel counts)
            pl.BlockSpec((Cout, Cin), lambda n, l: (0, 0)),
            pl.BlockSpec((Cout, 1), lambda n, l: (0, 0)),
        ],
        out_specs=pl.BlockSpec((pl.Squeezed(), Cout, TL), lambda n, l: (n, 0, l)),
        compiler_params=pltpu.CompilerParams(
            dimension_semantics=("parallel", "parallel"),
        ),
        cost_estimate=cost,
    )(xs, wm, bm)

    return out.reshape(N, Cout, Ho, Wo)   # free reshape in NCHW


if __name__ == "__main__":
    key = jax.random.PRNGKey(0)
    k_x, k_w, k_b = jax.random.split(key, 3)

    N, Cin, H, W = 2, 4, 16, 16
    Cout = 8

    x = jax.random.normal(k_x, (N, Cin, H, W), dtype=jnp.float32)
    # deterministic parameter init (uniform, PyTorch Conv2d default scale)
    fan_in = Cin * 1 * 1
    bound = 1.0 / (fan_in ** 0.5)
    weight = jax.random.uniform(k_w, (Cout, Cin, 1, 1), jnp.float32, -bound, bound)
    bias = jax.random.uniform(k_b, (Cout,), jnp.float32, -bound, bound)

    # pure-JAX reference (1x1 conv stride 2 in NCHW)
    y_ref = jax.lax.conv_general_dilated(
        x, weight, window_strides=(2, 2), padding="VALID",
        dimension_numbers=("NCHW", "OIHW", "NCHW"),
    ) + bias.reshape(1, Cout, 1, 1)

    # f32 path — tight numerics
    y = jax.block_until_ready(subsumpling_forward(x, weight, bias))
    assert y.shape == (N, Cout, (H - 1) // 2 + 1, (W - 1) // 2 + 1), y.shape
    assert jnp.allclose(y, y_ref, atol=1e-5, rtol=1e-5)

    # bf16 activations/weight (f32 accumulation) — halves HBM traffic of this
    # bandwidth-bound kernel; tolerance relaxed for bf16 inputs.
    y_bf16 = jax.block_until_ready(
        subsumpling_forward(x, weight, bias, compute_dtype=jnp.bfloat16))
    assert y_bf16.shape == y.shape
    assert jnp.allclose(y_bf16, y_ref, atol=5e-2, rtol=5e-2)

    print("KERNEL_OK")
</pallas_src>

<mosaic_0001>
module attributes {stable_mosaic.version = 11 : i64} {
  func.func @conv1x1_kernel(%arg0: i32, %arg1: i32, %arg2: memref<1x4x64xf32, #tpu.memory_space<vmem>>, %arg3: memref<8x4xf32, #tpu.memory_space<vmem>>, %arg4: memref<8x1xf32, #tpu.memory_space<vmem>>, %arg5: memref<1x8x64xf32, #tpu.memory_space<vmem>>) attributes {dimension_semantics = [#tpu.dimension_semantics<parallel>, #tpu.dimension_semantics<parallel>], iteration_bounds = array<i64: 2, 1>, scalar_prefetch = 0 : i64, scratch_operands = 0 : i64, tpu.core_type = #tpu.core_type<tc>, window_params = [{transform_indices = @transform_0, window_bounds = array<i64: 1, 4, 64>}, {pipeline_mode = #tpu.pipeline_mode<synchronous>, transform_indices = @transform_1, window_bounds = array<i64: 8, 4>}, {pipeline_mode = #tpu.pipeline_mode<synchronous>, transform_indices = @transform_2, window_bounds = array<i64: 8, 1>}, {transform_indices = @transform_3, window_bounds = array<i64: 1, 8, 64>}]} {
    %c0 = arith.constant 0 : index
    %c0_0 = arith.constant 0 : index
    %0 = vector.load %arg3[%c0, %c0_0] : memref<8x4xf32, #tpu.memory_space<vmem>>, vector<8x4xf32>
    %c0_1 = arith.constant 0 : index
    %c0_2 = arith.constant 0 : index
    %c0_3 = arith.constant 0 : index
    %1 = vector.load %arg2[%c0_1, %c0_2, %c0_3] : memref<1x4x64xf32, #tpu.memory_space<vmem>>, vector<1x4x64xf32>
    %2 = vector.shape_cast %1 : vector<1x4x64xf32> to vector<4x64xf32>
    %cst = arith.constant dense<0.000000e+00> : vector<8x64xf32>
    %3 = tpu.matmul %0, %2, %cst {dimension_numbers = #tpu.dot_dimension_numbers<[1], [0], [0], [1], [0, 0, 1, 1], [], []>} : vector<8x4xf32>, vector<4x64xf32>, vector<8x64xf32> -> vector<8x64xf32>
    %c0_4 = arith.constant 0 : index
    %c0_5 = arith.constant 0 : index
    %4 = vector.load %arg4[%c0_4, %c0_5] : memref<8x1xf32, #tpu.memory_space<vmem>>, vector<8x1xf32>
    %5 = vector.broadcast %4 : vector<8x1xf32> to vector<8x64xf32>
    %6 = arith.addf %3, %5 : vector<8x64xf32>
    %c0_6 = arith.constant 0 : index
    %c0_7 = arith.constant 0 : index
    %c0_8 = arith.constant 0 : index
    %7 = vector.load %arg5[%c0_6, %c0_7, %c0_8] : memref<1x8x64xf32, #tpu.memory_space<vmem>>, vector<1x8x64xf32>
    %8 = vector.shape_cast %7 : vector<1x8x64xf32> to vector<8x64xf32>
    %9 = vector.shape_cast %6 : vector<8x64xf32> to vector<1x8x64xf32>
    tpu.vector_store %arg5[%c0_6, %c0_7, %c0_8], %9 {strides = array<i32>} : memref<1x8x64xf32, #tpu.memory_space<vmem>>, vector<1x8x64xf32>,
    return
  }
  func.func @transform_0(%arg0: i32, %arg1: i32) -> (i32, i32, i32) {
    %c0_i32 = arith.constant 0 : i32
    %c0_i32_0 = arith.constant 0 : i32
    return %arg0, %c0_i32, %arg1 : i32, i32, i32
  }
  func.func @transform_1(%arg0: i32, %arg1: i32) -> (i32, i32) {
    %c0_i32 = arith.constant 0 : i32
    %c0_i32_0 = arith.constant 0 : i32
    %c0_i32_1 = arith.constant 0 : i32
    return %c0_i32, %c0_i32_0 : i32, i32
  }
  func.func @transform_2(%arg0: i32, %arg1: i32) -> (i32, i32) {
    %c0_i32 = arith.constant 0 : i32
    %c0_i32_0 = arith.constant 0 : i32
    %c0_i32_1 = arith.constant 0 : i32
    return %c0_i32, %c0_i32_0 : i32, i32
  }
  func.func @transform_3(%arg0: i32, %arg1: i32) -> (i32, i32, i32) {
    %c0_i32 = arith.constant 0 : i32
    %c0_i32_0 = arith.constant 0 : i32
    return %arg0, %c0_i32, %arg1 : i32, i32, i32
  }
}

</mosaic_0001>

<bundles_post_ra>
// kernel: tpu_custom_call.1
= control target key start
LH: loop header
LB: loop body
LE: loop exit
PB: predicated region body
PF: predicated region fallthrough
CT: control target
= control target key end

     0   :  { %8 = vsyncpa [#allocation3], 0  ;;  %s657_s0 = inlined_call_operand.vmem [shape: f32[2,4,64], index: 0, kind: input, shape index: {}]   ;;  %s658_s1 = inlined_call_operand.vmem [shape: f32[8,4], index: 1, kind: input, shape index: {}]   ;;  %s659_s2 = inlined_call_operand.vmem [shape: f32[8,1], index: 2, kind: input, shape index: {}]   ;;  %s660_s3 = inlined_call_operand.hbm [shape: f32[2,8,64], index: 3, kind: output, shape index: {}]  }
   0x1   :  { %10 = vsyncpa [#allocation3 + $0x1], 0  ;;  %s546_s12 = smov 0   ;;  %s548_s13 = smov 0  }
   0x2   :  { %s550_s14 = smov 0   ;;  %s552_s15 = smov 0  }
   0x3   :  { %s554_s16 = smov 0   ;;  %s556_s17 = smov 0  }
   0x4 LB: > { %s365_s18 = sadd.s32 4294967295, %s520_s17   ;;  %s366_s19 = sadd.s32 4294967294, %s520_s17   ;;  %s520_s17 = sphi %s556_s17, %s16_s17   ;;  %s516_s16 = sphi %s554_s16, %s667_s16   ;;  %s512_s15 = sphi %s552_s15, %s666_s15   ;;  %s508_s14 = sphi %s550_s14, %s665_s14   ;;  %s504_s13 = sphi %s548_s13, %s664_s13   ;;  %s500_s12 = sphi %s546_s12, %s663_s12  }
   0x5   : > { %s28_s20 = sadd.s32 1, %s516_s16  ;;  %s107_s21 = sadd.s32 1, %s508_s14 }
   0x6   : > { %p30_p0 = scmp.ge.s32.totalorder %s28_s20, 2  ;;  %p117_p1 = scmp.ne.s32.totalorder %s508_s14, %s504_s13 }
   0x7   : > { %p118_p2 = scmp.eq.s32.totalorder %s365_s18, 1  ;;  %p123_p3 = scmp.ne.s32.totalorder %s504_s13, %s500_s12 }
   0x8   : > { %s669_s20 = smov (%p30_p0, %s28_s20), 0  ;;  %p124_p5 = scmp.eq.s32.totalorder %s366_s19, 1 }
   0x9   : > { %p586_p4 = por %p118_p2, %p117_p1  ;;  %s102_s23 = ssub.s32 %s516_s16, %s669_s20 }
   0xa   : > { %p369_p6 = scmp.ge.s32.totalorder %s520_s17, 1  ;;  %p105_p7 = scmp.eq.s32.totalorder %s102_s23, 0 }
   0xb   : > { %p593_p8 = por %p124_p5, %p123_p3  ;;  %p158_p9 = scmp.lt.s32.totalorder %s520_s17, 3 }
   0xc   : > { %s599_s25 = scalar_select %p105_p7, %s508_s14, %s107_s21  }
   0xd   : > { %p159_p10 = pnand %p369_p6, %p158_p9 }
   0xe   : > { %p184_p11 = scmp.lt.s32.totalorder (!%p159_p10), %s512_s15, 1  ;;  %s181_s8 = sand.u32 (!%p159_p10), 1, %s504_s13  }
   0xf   : > { %162 = sbr.rel (%p159_p10) target bundleno = 234 (0xea), region = 32  ;;  %s370_s9 = sshll.u32 (!%p159_p10), %s181_s8, 3 }
  0x10   : > { %s375_s10 = sshll.u32 (!%p159_p10), %s512_s15, 7  ;;  %s183_s11 = scalar_lea.vmem (!%p159_p10), [#allocation2], %s370_s9 }
  0x11   : > { %s294_s18 = sshll.u32 (!%p159_p10), %s183_s11, 4  ;;  %s617_s23 = scalar_lea.hbm (!%p159_p10), %s660_s3, %s375_s10  ;;  %s295_s18 = int_to_ptr.vmem [resolvable:$true] %s294_s18 }
  0x12   : > { %s280_s26 = scalar_lea.sflag (!%p159_p10), [#allocation3], %s181_s8  ;;  %s444_s27 = scalar_lea.vmem (!%p159_p10), %s295_s18, 128 }
  0x13   : > { %p445_p12 = scmp.ne.s32.totalorder (!%p159_p10), %s295_s18, %s444_s27 }
  0x14   : > { %v522_v0 = vmov 0.0   ;;  %vm523_vm0 = vmmov 0   ;;  %v193_v1 = vld [vmem:[%s659_s2] sm:$0xff]  ;;  %s185_s28 = scalar_select %p184_p11, %s512_s15, 1  ;;  %v524_v2 = vmov 0   ;;  %vm203_vm1 = vcmask 1043456  }
  0x15   : > { %380 = vmatprep.subr.mxu0 %v522_v0  ;;  %382 = vmatprep.mubr.msk.f32.mxu0 %vm523_vm0, %v522_v0  ;;  %v191_v3 = vld [vmem:[%s658_s1] sm:$0xff]  ;;  %vm199_vm2 = vcmask 31744   ;;  %vm277_vm3 = vcmask 523264   ;;  %p446_p13 = pnand %p445_p12, %p586_p4  ;;  %s525_s15 = smov [#allocation2]  }
  0x16   : > { %443 = vset.pattern.permute.xlu0 %v524_v2  ;;  %s371_s29 = sshll.u32 %s185_s28, 2  ;;  %s448_s28 = sshll.u32 %s525_s15, 4  ;;  %s449_s28 = int_to_ptr.vmem [resolvable:$false] %s448_s28 }
  0x17   : > { %196 = vperm.xlu0 %443, %v193_v1   ;;  %s190_s5 = scalar_lea.vmem %s657_s0, %s371_s29  ;;  %p447_p0 = pneg %p446_p13 }
  0x18   : > { %v192_v4 = vld [vmem:[%s190_s5] sm:$0xf]  ;;  %s450_s29 = scalar_lea.vmem %s449_s28, 256  ;;  %p451_p1 = scmp.lt.s32.totalorder %s295_s18, %s449_s28 }
  0x19   : > { %381 = vmatpush3.msk.msra.mxu0 %vm203_vm1, %v192_v4  ;;  %p452_p2 = scmp.lt.s32.totalorder %s450_s29, %s444_s27 }
  0x1a   : > { %383 = vmatmul.mubr.msk.f32.vlgmr.msra.gmra.mxu0 %vm199_vm2, %v191_v3 }
  0x1b   : > { %p453_p3 = por %p452_p2, %p451_p1 }
  0x1d   : > { %p454_p5 = pnand %p453_p3, %p447_p0 }
  0x92   : > { %v197_v5 = vpop.permute.xlu0 %196 }
  0xda   : > { %v273_v6 = vpop.f32.mrf.mxu0 }
  0xdb   : > { %v274_v7 = vadd.f32 %v273_v6, %v197_v5 }
  0xdc   : > { %v384_v8 = vpop.f32.mrf.mxu0 }
  0xdd   : > { %278 = vst.msk [vmem:[%s183_s11] sm:$0xff] %vm277_vm3, %v274_v7 }
  0xde   : > { %457 = shalt.err (!%p454_p5)
}
  0xdf   : > { %s458_s30 = scalar_lea.hbm %s617_s23, 128  ;;  %s462_s6 = scalar_lea.hbm %s660_s3, 256 }
  0xe0   : > { %p459_p6 = scmp.ne.s32.totalorder %s617_s23, %s458_s30  ;;  %p463_p10 = scmp.lt.s32.totalorder %s617_s23, %s660_s3 }
  0xe1   : > { %p464_p11 = scmp.lt.s32.totalorder %s462_s6, %s458_s30 }
  0xe2   : > { %p460_p7 = pnand %p459_p6, %p586_p4 }
  0xe3   : > { %p465_p12 = por %p464_p11, %p463_p10 }
  0xe4   : > { %p461_p9 = pneg %p460_p7 }
  0xe6   : > { %p466_p13 = pnand %p465_p12, %p461_p9 }
  0xe8   : > { %469 = shalt.err (!%p466_p13)
}
  0xe9   : > { %385 = dma.vmem_to_hbm [thread:$0]  (%p586_p4), %s295_s18, 128, %s617_s23, %s280_s26  }
  0xea PF: > { %p391_p0 = scmp.ge.s32.totalorder %s520_s17, 2  ;;  %s306_s9 = sand.u32 1, %s500_s12  }
  0xeb   : > { %s307_s10 = scalar_lea.sflag [#allocation3], %s306_s9 }
  0xec   : > { %p388_p1 = pnand %p391_p0, %p593_p8 }
  0xee   : > { %p389_p2 = pneg %p388_p1 }
  0xf0   : > { %495 = dma.done.wait (%p389_p2), %s307_s10, 128  }
  0xf1   : > { %497 = vsyncadd (%p389_p2), %s307_s10, 4294967168  ;;  %s16_s17 = sadd.s32 1, %s520_s17   ;;  %s663_s12 = smov %s504_s13 }
  0xf2   : > { %p13_p3 = scmp.ge.s32.totalorder %s16_s17, 4   ;;  %s664_s13 = smov %s508_s14 }
  0xf3   : > { %s665_s14 = smov %s599_s25  ;;  %s666_s15 = smov %s516_s16 }
  0xf4   : > { %s667_s16 = smov %s669_s20  ;;  %15 = sbr.rel (!%p13_p3) target bundleno = 4 (0x4), region = 67 }
  0xf9   :  { %312 = vsyncpa [#allocation3], 1 }
  0xfa   :  { %314 = vsyncpa [#allocation3 + $0x1], 1 }

</bundles_post_ra>
